<compile_context>
chip_gen: v6e
topology: v6e:2x2x1
jax: 0.10.0
libtpu: 0.0.40
codegen_flags: <defaults>
</compile_context>

<pallas_src>
import jax
import jax.numpy as jnp
from jax.experimental import pallas as pl
from jax.experimental.pallas import tpu as pltpu

NUM_CLASSES = 3          # hard-coded by the reference module
MAX_TILE_ROWS = 128      # 128 * 128 lanes = 16384 px / class / step (v7x-safe)


def _dice_partial_kernel(preds_ref, tgt_ref, acc_ref):
    # preds_ref: (1, 3, TILE_R, 128) native dtype
    # tgt_ref:   (1, TILE_R, 128) int32
    # acc_ref:   (1, 9, 128) f32   rows 0-2: intersection, 3-5: preds_sum, 6-8: tgt_count
    n = pl.program_id(1)

    @pl.when(n == 0)
    def _zero():
        acc_ref[...] = jnp.zeros_like(acc_ref)

    p0 = preds_ref[0, 0].astype(jnp.float32)
    p1 = preds_ref[0, 1].astype(jnp.float32)
    p2 = preds_ref[0, 2].astype(jnp.float32)
    tgt = tgt_ref[0]

    # softmax across the 3 classes, fully elementwise (no cross-sublane work)
    m = jnp.maximum(p0, jnp.maximum(p1, p2))
    e0 = jnp.exp(p0 - m)
    e1 = jnp.exp(p1 - m)
    e2 = jnp.exp(p2 - m)
    inv = pl.reciprocal(e0 + e1 + e2, approx=False)   # exact: keeps 1e-5 tolerance
    s0 = e0 * inv
    s1 = e1 * inv
    s2 = e2 * inv

    # per-class masks on the fly (no one-hot materialization)
    c0 = (tgt == 0).astype(jnp.float32)
    c1 = (tgt == 1).astype(jnp.float32)
    c2 = (tgt == 2).astype(jnp.float32)

    def rsum(x):  # sublane-only reduce -> (1, 128); cross-lane reduce deferred to epilogue
        return jnp.sum(x, axis=0, keepdims=True)

    rows = jnp.concatenate(
        [
            rsum(s0 * c0), rsum(s1 * c1), rsum(s2 * c2),   # intersection
            rsum(s0), rsum(s1), rsum(s2),                  # preds_sum
            rsum(c0), rsum(c1), rsum(c2),                  # target count
        ],
        axis=0,
    )                                                      # (9, 128)

    acc_ref[0] += rows


def dice_loss(preds, targets, epsilon=1e-6, max_tile_rows=MAX_TILE_ROWS):
    """preds: (B, C, H, W) float logits, targets: (B, H, W) int labels in [0, C)."""
    B, C, H, W = preds.shape
    assert C == NUM_CLASSES, "reference module hard-codes 3 classes"
    N = H * W

    # --- spatial tiling: (B, C, N) -> (B, C, R, 128), tile R in chunks of tile_r ---
    r_raw = -(-N // 128)
    if r_raw <= max_tile_rows:
        tile_r = r_raw                       # single spatial step (block == full dims)
        r_pad = r_raw
    else:
        tile_r = max_tile_rows               # multiple of 8
        r_pad = -(-r_raw // tile_r) * tile_r
    n_pad = r_pad * 128
    pad = n_pad - N

    p = preds.reshape(B, C, N)               # keep native dtype; upcast inside kernel
    t = targets.reshape(B, N).astype(jnp.int32)
    if pad > 0:
        # Padded pixels: class-0-dominant logits + label 0.  All of their
        # contribution lands on the background class, which the loss ignores.
        neg = jnp.asarray(-1e9, dtype=p.dtype)
        pad_block = jnp.concatenate(
            [jnp.zeros((B, 1, pad), p.dtype),
             jnp.full((B, C - 1, pad), neg, p.dtype)],
            axis=1,
        )
        p = jnp.concatenate([p, pad_block], axis=2)
        t = jnp.concatenate([t, jnp.zeros((B, pad), jnp.int32)], axis=1)

    p4 = p.reshape(B, C, r_pad, 128)
    t3 = t.reshape(B, r_pad, 128)

    grid = (B, r_pad // tile_r)
    bytes_accessed = (p4.size * jnp.dtype(p4.dtype).itemsize
                      + t3.size * 4 + B * 3 * C * 128 * 4)

    acc = pl.pallas_call(
        _dice_partial_kernel,
        out_shape=jax.ShapeDtypeStruct((B, 3 * C, 128), jnp.float32),
        grid=grid,
        in_specs=[
            pl.BlockSpec((1, C, tile_r, 128), lambda b, n: (b, 0, n, 0)),
            pl.BlockSpec((1, tile_r, 128), lambda b, n: (b, n, 0)),
        ],
        out_specs=pl.BlockSpec((1, 3 * C, 128), lambda b, n: (b, 0, 0)),
        compiler_params=pltpu.CompilerParams(
            dimension_semantics=("parallel", "arbitrary"),
            vmem_limit_bytes=32 * 1024 * 1024,
        ),
        cost_estimate=pl.CostEstimate(
            flops=25 * B * C * n_pad,
            transcendentals=B * C * n_pad,
            bytes_accessed=int(bytes_accessed),
        ),
    )(p4, t3)

    # --- tiny epilogue in plain JAX (exactly mirrors the PyTorch tail) ---
    sums = jnp.sum(acc, axis=-1)                           # (B, 9)
    inter, psum, tcnt = sums[:, 0:3], sums[:, 3:6], sums[:, 6:9]
    class_exists = (tcnt > 0).astype(jnp.float32)
    union = psum + tcnt
    dice = (2.0 * inter + epsilon) / (union + epsilon)
    dice_l = 1.0 - dice
    fg_dl = dice_l[:, 1:]
    fg_ex = class_exists[:, 1:]
    nfg = fg_ex.sum(axis=1)
    include = (nfg > 0).astype(jnp.float32)
    sample = include * (fg_dl * fg_ex).sum(axis=1) / jnp.maximum(nfg, 1.0)
    cnt = include.sum()
    return jnp.where(cnt > 0, sample.sum() / jnp.maximum(cnt, 1.0), jnp.float32(0.0))


def _dice_loss_ref(preds, targets, epsilon=1e-6):
    # pure-JAX reference mirroring the PyTorch forward
    B, C, H, W = preds.shape
    N = H * W
    p = jax.nn.softmax(preds.astype(jnp.float32), axis=1).reshape(B, C, N)
    t = targets.reshape(B, N)
    oh = jax.nn.one_hot(t, NUM_CLASSES, axis=1, dtype=jnp.float32)
    class_exists = (oh.sum(axis=2) > 0).astype(jnp.float32)
    inter = (p * oh).sum(axis=2)
    union = p.sum(axis=2) + oh.sum(axis=2)
    dl = 1.0 - (2.0 * inter + epsilon) / (union + epsilon)
    fg_dl, fg_ex = dl[:, 1:], class_exists[:, 1:]
    nfg = fg_ex.sum(axis=1)
    include = (nfg > 0).astype(jnp.float32)
    sample = include * (fg_dl * fg_ex).sum(axis=1) / jnp.maximum(nfg, 1.0)
    cnt = include.sum()
    return jnp.where(cnt > 0, sample.sum() / jnp.maximum(cnt, 1.0), 0.0)


if __name__ == "__main__":
    key = jax.random.PRNGKey(0)
    k1, k2, k3, k4 = jax.random.split(key, 4)

    B, C, H, W = 2, 3, 16, 16
    preds = jax.random.normal(k1, (B, C, H, W), dtype=jnp.float32)
    targets = jax.random.randint(k2, (B, H, W), 0, NUM_CLASSES, dtype=jnp.int32)
    loss = jax.block_until_ready(dice_loss(preds, targets))
    ref = jax.block_until_ready(_dice_loss_ref(preds, targets))
    assert jnp.allclose(loss, ref, atol=1e-5, rtol=1e-5), (loss, ref)

    # ragged spatial size (N = 120, padded to 128) exercises the padding path
    H2, W2 = 10, 12
    preds2 = jax.random.normal(k3, (B, C, H2, W2), dtype=jnp.float32)
    targets2 = jax.random.randint(k4, (B, H2, W2), 0, NUM_CLASSES, dtype=jnp.int32)
    loss2 = jax.block_until_ready(dice_loss(preds2, targets2))
    ref2 = jax.block_until_ready(_dice_loss_ref(preds2, targets2))
    assert jnp.allclose(loss2, ref2, atol=1e-5, rtol=1e-5), (loss2, ref2)

    print("KERNEL_OK")
</pallas_src>

<mosaic_0001>
module attributes {stable_mosaic.version = 11 : i64} {
  func.func @_dice_partial_kernel(%arg0: i32, %arg1: i32, %arg2: memref<1x3x2x128xf32, #tpu.memory_space<vmem>>, %arg3: memref<1x2x128xi32, #tpu.memory_space<vmem>>, %arg4: memref<1x9x128xf32, #tpu.memory_space<vmem>>) attributes {dimension_semantics = [#tpu.dimension_semantics<parallel>, #tpu.dimension_semantics<arbitrary>], iteration_bounds = array<i64: 2, 1>, scalar_prefetch = 0 : i64, scratch_operands = 0 : i64, tpu.core_type = #tpu.core_type<tc>, window_params = [{transform_indices = @transform_0, window_bounds = array<i64: 1, 3, 2, 128>}, {transform_indices = @transform_1, window_bounds = array<i64: 1, 2, 128>}, {transform_indices = @transform_2, window_bounds = array<i64: 1, 9, 128>}]} {
    %c0_i32 = arith.constant 0 : i32
    %0 = arith.cmpi eq, %arg1, %c0_i32 : i32
    %1 = arith.extui %0 : i1 to i32
    %c0_i32_0 = arith.constant 0 : i32
    %2 = arith.cmpi ne, %1, %c0_i32_0 : i32
    scf.if %2 {
      %cst_28 = arith.constant 0.000000e+00 : f32
      %65 = vector.broadcast %cst_28 : f32 to vector<1x9x128xf32>
      %c0_29 = arith.constant 0 : index
      %c0_30 = arith.constant 0 : index
      %c0_31 = arith.constant 0 : index
      %66 = vector.load %arg4[%c0_29, %c0_30, %c0_31] : memref<1x9x128xf32, #tpu.memory_space<vmem>>, vector<1x9x128xf32>
      tpu.vector_store %arg4[%c0_29, %c0_30, %c0_31], %65 {strides = array<i32>} : memref<1x9x128xf32, #tpu.memory_space<vmem>>, vector<1x9x128xf32>,
    } else {
    }
    %c0 = arith.constant 0 : index
    %c0_1 = arith.constant 0 : index
    %c0_2 = arith.constant 0 : index
    %c0_3 = arith.constant 0 : index
    %3 = vector.load %arg2[%c0, %c0_1, %c0_2, %c0_3] : memref<1x3x2x128xf32, #tpu.memory_space<vmem>>, vector<1x1x2x128xf32>
    %4 = vector.shape_cast %3 : vector<1x1x2x128xf32> to vector<2x128xf32>
    %c0_4 = arith.constant 0 : index
    %c1 = arith.constant 1 : index
    %c0_5 = arith.constant 0 : index
    %c0_6 = arith.constant 0 : index
    %5 = vector.load %arg2[%c0_4, %c1, %c0_5, %c0_6] : memref<1x3x2x128xf32, #tpu.memory_space<vmem>>, vector<1x1x2x128xf32>
    %6 = vector.shape_cast %5 : vector<1x1x2x128xf32> to vector<2x128xf32>
    %c0_7 = arith.constant 0 : index
    %c2 = arith.constant 2 : index
    %c0_8 = arith.constant 0 : index
    %c0_9 = arith.constant 0 : index
    %7 = vector.load %arg2[%c0_7, %c2, %c0_8, %c0_9] : memref<1x3x2x128xf32, #tpu.memory_space<vmem>>, vector<1x1x2x128xf32>
    %8 = vector.shape_cast %7 : vector<1x1x2x128xf32> to vector<2x128xf32>
    %c0_10 = arith.constant 0 : index
    %c0_11 = arith.constant 0 : index
    %c0_12 = arith.constant 0 : index
    %9 = vector.load %arg3[%c0_10, %c0_11, %c0_12] : memref<1x2x128xi32, #tpu.memory_space<vmem>>, vector<1x2x128xi32>
    %10 = vector.shape_cast %9 : vector<1x2x128xi32> to vector<2x128xi32>
    %11 = arith.maximumf %6, %8 : vector<2x128xf32>
    %12 = arith.maximumf %4, %11 : vector<2x128xf32>
    %13 = arith.subf %4, %12 : vector<2x128xf32>
    %14 = math.exp %13 : vector<2x128xf32>
    %15 = arith.subf %6, %12 : vector<2x128xf32>
    %16 = math.exp %15 : vector<2x128xf32>
    %17 = arith.subf %8, %12 : vector<2x128xf32>
    %18 = math.exp %17 : vector<2x128xf32>
    %19 = arith.addf %14, %16 : vector<2x128xf32>
    %20 = arith.addf %19, %18 : vector<2x128xf32>
    %21 = tpu.reciprocal %20 : vector<2x128xf32> -> vector<2x128xf32>
    %22 = arith.mulf %14, %21 : vector<2x128xf32>
    %23 = arith.mulf %16, %21 : vector<2x128xf32>
    %24 = arith.mulf %18, %21 : vector<2x128xf32>
    %c0_i32_13 = arith.constant 0 : i32
    %25 = vector.broadcast %c0_i32_13 : i32 to vector<2x128xi32>
    %26 = arith.cmpi eq, %10, %25 : vector<2x128xi32>
    %27 = arith.extui %26 : vector<2x128xi1> to vector<2x128xi32>
    %28 = arith.sitofp %27 : vector<2x128xi32> to vector<2x128xf32>
    %c1_i32 = arith.constant 1 : i32
    %29 = vector.broadcast %c1_i32 : i32 to vector<2x128xi32>
    %30 = arith.cmpi eq, %10, %29 : vector<2x128xi32>
    %31 = arith.extui %30 : vector<2x128xi1> to vector<2x128xi32>
    %32 = arith.sitofp %31 : vector<2x128xi32> to vector<2x128xf32>
    %c2_i32 = arith.constant 2 : i32
    %33 = vector.broadcast %c2_i32 : i32 to vector<2x128xi32>
    %34 = arith.cmpi eq, %10, %33 : vector<2x128xi32>
    %35 = arith.extui %34 : vector<2x128xi1> to vector<2x128xi32>
    %36 = arith.sitofp %35 : vector<2x128xi32> to vector<2x128xf32>
    %37 = arith.mulf %22, %28 : vector<2x128xf32>
    %cst = arith.constant dense<0.000000e+00> : vector<128xf32>
    %38 = vector.multi_reduction <add>, %37, %cst [0] : vector<2x128xf32> to vector<128xf32>
    %39 = vector.shape_cast %38 : vector<128xf32> to vector<1x128xf32>
    %40 = arith.mulf %23, %32 : vector<2x128xf32>
    %cst_14 = arith.constant dense<0.000000e+00> : vector<128xf32>
    %41 = vector.multi_reduction <add>, %40, %cst_14 [0] : vector<2x128xf32> to vector<128xf32>
    %42 = vector.shape_cast %41 : vector<128xf32> to vector<1x128xf32>
    %43 = arith.mulf %24, %36 : vector<2x128xf32>
    %cst_15 = arith.constant dense<0.000000e+00> : vector<128xf32>
    %44 = vector.multi_reduction <add>, %43, %cst_15 [0] : vector<2x128xf32> to vector<128xf32>
    %45 = vector.shape_cast %44 : vector<128xf32> to vector<1x128xf32>
    %cst_16 = arith.constant dense<0.000000e+00> : vector<128xf32>
    %46 = vector.multi_reduction <add>, %22, %cst_16 [0] : vector<2x128xf32> to vector<128xf32>
    %47 = vector.shape_cast %46 : vector<128xf32> to vector<1x128xf32>
    %cst_17 = arith.constant dense<0.000000e+00> : vector<128xf32>
    %48 = vector.multi_reduction <add>, %23, %cst_17 [0] : vector<2x128xf32> to vector<128xf32>
    %49 = vector.shape_cast %48 : vector<128xf32> to vector<1x128xf32>
    %cst_18 = arith.constant dense<0.000000e+00> : vector<128xf32>
    %50 = vector.multi_reduction <add>, %24, %cst_18 [0] : vector<2x128xf32> to vector<128xf32>
    %51 = vector.shape_cast %50 : vector<128xf32> to vector<1x128xf32>
    %cst_19 = arith.constant dense<0.000000e+00> : vector<128xf32>
    %52 = vector.multi_reduction <add>, %28, %cst_19 [0] : vector<2x128xf32> to vector<128xf32>
    %53 = vector.shape_cast %52 : vector<128xf32> to vector<1x128xf32>
    %cst_20 = arith.constant dense<0.000000e+00> : vector<128xf32>
    %54 = vector.multi_reduction <add>, %32, %cst_20 [0] : vector<2x128xf32> to vector<128xf32>
    %55 = vector.shape_cast %54 : vector<128xf32> to vector<1x128xf32>
    %cst_21 = arith.constant dense<0.000000e+00> : vector<128xf32>
    %56 = vector.multi_reduction <add>, %36, %cst_21 [0] : vector<2x128xf32> to vector<128xf32>
    %57 = vector.shape_cast %56 : vector<128xf32> to vector<1x128xf32>
    %58 = tpu.concatenate %39, %42, %45, %47, %49, %51, %53, %55, %57 in 0 : vector<1x128xf32>, vector<1x128xf32>, vector<1x128xf32>, vector<1x128xf32>, vector<1x128xf32>, vector<1x128xf32>, vector<1x128xf32>, vector<1x128xf32>, vector<1x128xf32> -> vector<9x128xf32>
    %c0_22 = arith.constant 0 : index
    %c0_23 = arith.constant 0 : index
    %c0_24 = arith.constant 0 : index
    %59 = vector.load %arg4[%c0_22, %c0_23, %c0_24] : memref<1x9x128xf32, #tpu.memory_space<vmem>>, vector<1x9x128xf32>
    %60 = vector.shape_cast %59 : vector<1x9x128xf32> to vector<9x128xf32>
    %61 = arith.addf %60, %58 : vector<9x128xf32>
    %c0_25 = arith.constant 0 : index
    %c0_26 = arith.constant 0 : index
    %c0_27 = arith.constant 0 : index
    %62 = vector.load %arg4[%c0_25, %c0_26, %c0_27] : memref<1x9x128xf32, #tpu.memory_space<vmem>>, vector<1x9x128xf32>
    %63 = vector.shape_cast %62 : vector<1x9x128xf32> to vector<9x128xf32>
    %64 = vector.shape_cast %61 : vector<9x128xf32> to vector<1x9x128xf32>
    tpu.vector_store %arg4[%c0_25, %c0_26, %c0_27], %64 {strides = array<i32>} : memref<1x9x128xf32, #tpu.memory_space<vmem>>, vector<1x9x128xf32>,
    return
  }
  func.func @transform_0(%arg0: i32, %arg1: i32) -> (i32, i32, i32, i32) {
    %c0_i32 = arith.constant 0 : i32
    %c0_i32_0 = arith.constant 0 : i32
    %c0_i32_1 = arith.constant 0 : i32
    return %arg0, %c0_i32, %arg1, %c0_i32_0 : i32, i32, i32, i32
  }
  func.func @transform_1(%arg0: i32, %arg1: i32) -> (i32, i32, i32) {
    %c0_i32 = arith.constant 0 : i32
    %c0_i32_0 = arith.constant 0 : i32
    return %arg0, %arg1, %c0_i32 : i32, i32, i32
  }
  func.func @transform_2(%arg0: i32, %arg1: i32) -> (i32, i32, i32) {
    %c0_i32 = arith.constant 0 : i32
    %c0_i32_0 = arith.constant 0 : i32
    %c0_i32_1 = arith.constant 0 : i32
    return %arg0, %c0_i32, %c0_i32_0 : i32, i32, i32
  }
}

</mosaic_0001>

<bundles_post_ra>
// kernel: tpu_custom_call.1
= control target key start
LH: loop header
LB: loop body
LE: loop exit
PB: predicated region body
PF: predicated region fallthrough
CT: control target
= control target key end

     0   :  { %7 = vsyncpa [#allocation3], 0  ;;  %s803_s0 = inlined_call_operand.hbm [shape: f32[2,3,2,128], index: 0, kind: input, shape index: {}]   ;;  %s804_s1 = inlined_call_operand.hbm [shape: s32[2,2,128], index: 1, kind: input, shape index: {}]   ;;  %s805_s2 = inlined_call_operand.vmem [shape: f32[2,9,128], index: 2, kind: output, shape index: {}]  }
   0x1   :  { %9 = vsyncpa [#allocation3 + $0x1], 0 }
   0x2   :  { %10 = vsyncpa [#allocation5], 0 }
   0x3   :  { %12 = vsyncpa [#allocation5 + $0x1], 0  ;;  %s669_s9 = smov 0   ;;  %s671_s10 = smov 0  }
   0x4   :  { %s673_s11 = smov 0   ;;  %s675_s12 = smov 0  }
   0x5   :  { %s677_s13 = smov 0   ;;  %s679_s14 = smov 0  }
   0x6 LB: > { %s444_s15 = sadd.s32 4294967295, %s647_s14   ;;  %s30_s16 = sadd.s32 1, %s643_s13  ;;  %s647_s14 = sphi %s679_s14, %s18_s14   ;;  %s643_s13 = sphi %s677_s13, %s813_s13   ;;  %s639_s12 = sphi %s675_s12, %s812_s12   ;;  %s635_s11 = sphi %s673_s11, %s811_s11   ;;  %s631_s10 = sphi %s671_s10, %s810_s10   ;;  %s627_s9 = sphi %s669_s9, %s809_s9  }
   0x7   : > { %p32_p0 = scmp.ge.s32.totalorder %s30_s16, 2  ;;  %s39_s17 = sadd.s32 1, %s635_s11 }
   0x8   : > { %p46_p1 = scmp.ne.s32.totalorder %s635_s11, %s631_s10  ;;  %p47_p2 = scmp.eq.s32.totalorder %s647_s14, 0 }
   0x9   : > { %s815_s16 = smov (%p32_p0, %s30_s16), 0  ;;  %p52_p4 = scmp.ne.s32.totalorder %s631_s10, %s627_s9 }
   0xa   : > { %p48_p3 = por %p47_p2, %p46_p1  ;;  %s34_s18 = ssub.s32 %s643_s13, %s815_s16 }
   0xb   : > { %p53_p5 = scmp.eq.s32.totalorder %s444_s15, 0  ;;  %p37_p6 = scmp.eq.s32.totalorder %s34_s18, 0 }
   0xc   : > { %p477_p8 = scmp.lt.s32.totalorder %s647_s14, 2  ;;  %s717_s21 = sand.u32 1, %s635_s11  }
   0xd   : > { %p708_p7 = por %p53_p5, %p52_p4  ;;  %s464_s22 = smul.u32 96, %s643_s13 }
   0xe   : > { %s714_s20 = scalar_select %p37_p6, %s635_s11, %s39_s17  }
   0xf   : > { %s463_s23 = smul.u32 6, %s717_s21  ;;  %s141_s26 = scalar_lea.hbm %s803_s0, %s464_s22 }
  0x10   : > { %p724_p9 = pnand %p477_p8, %p48_p3  ;;  %s131_s30 = scalar_lea.sflag [#allocation3], %s717_s21 }
  0x11   : > { %s134_s28 = scalar_lea.vmem [#allocation2], %s463_s23  ;;  %s649_s4 = smov [#allocation2]  }
  0x12   : > { %s142_s29 = sshll.u32 %s134_s28, 4  ;;  %p539_p10 = pneg %p724_p9  ;;  %s143_s29 = int_to_ptr.vmem [resolvable:$true] %s142_s29 }
  0x13   : > { %s550_s3 = scalar_lea.vmem %s143_s29, 96  ;;  %s555_s5 = sshll.u32 %s649_s4, 4  ;;  %s556_s5 = int_to_ptr.vmem [resolvable:$false] %s555_s5 }
  0x14   : > { %p551_p11 = scmp.ne.s32.totalorder %s143_s29, %s550_s3  ;;  %s557_s6 = scalar_lea.vmem %s556_s5, 192 }
  0x15   : > { %p558_p0 = scmp.lt.s32.totalorder %s143_s29, %s556_s5  ;;  %p559_p1 = scmp.lt.s32.totalorder %s557_s6, %s550_s3 }
  0x16   : > { %p553_p12 = pnand %p551_p11, %p539_p10 }
  0x17   : > { %p560_p2 = por %p559_p1, %p558_p0 }
  0x18   : > { %p554_p13 = pneg %p553_p12 }
  0x1a   : > { %p561_p3 = pnand %p560_p2, %p554_p13 }
  0x1c   : > { %564 = shalt.err (!%p561_p3)
}
  0x1d   : > { %s650_s7 = smov 32   ;;  %s651_s8 = smov 2  }
  0x1e   : > { %473 = dma.hbm_to_vmem [thread:$0]  (!%p724_p9), %s141_s26, 96, %s143_s29, %s131_s30, %s650_s7, %s650_s7, %s651_s8  }
  0x1f   : > { %p451_p4 = scmp.ge.s32.totalorder %s647_s14, 1  ;;  %p169_p5 = scmp.lt.s32.totalorder %s647_s14, 3 }
  0x20   : > { %s449_s9 = sshll.u32 %s717_s21, 1  ;;  %s450_s17 = sshll.u32 %s643_s13, 5 }
  0x21   : > { %p739_p6 = pnand %p451_p4, %p169_p5  ;;  %s156_s18 = scalar_lea.vmem [#allocation4], %s449_s9 }
  0x22   : > { %s164_s22 = sshll.u32 %s156_s18, 4  ;;  %s162_s25 = scalar_lea.hbm %s804_s1, %s450_s17  ;;  %s165_s22 = int_to_ptr.vmem [resolvable:$true] %s164_s22 }
  0x23   : > { %s153_s28 = scalar_lea.sflag [#allocation5], %s717_s21  ;;  %s578_s3 = scalar_lea.vmem %s165_s22, 32 }
  0x24   : > { %p579_p8 = scmp.ne.s32.totalorder %s165_s22, %s578_s3  ;;  %s652_s26 = smov [#allocation4]  }
  0x25   : > { %s583_s29 = sshll.u32 %s652_s26, 4  ;;  %s584_s29 = int_to_ptr.vmem [resolvable:$false] %s583_s29 }
  0x26   : > { %p581_p11 = pnand %p579_p8, %p539_p10  ;;  %s585_s30 = scalar_lea.vmem %s584_s29, 64 }
  0x27   : > { %p586_p13 = scmp.lt.s32.totalorder %s165_s22, %s584_s29  ;;  %p587_p0 = scmp.lt.s32.totalorder %s585_s30, %s578_s3 }
  0x28   : > { %p582_p12 = pneg %p581_p11 }
  0x29   : > { %p588_p1 = por %p587_p0, %p586_p13 }
  0x2b   : > { %p589_p2 = pnand %p588_p1, %p582_p12 }
  0x2d   : > { %592 = shalt.err (!%p589_p2)
}
  0x2e   : > { %476 = dma.hbm_to_vmem [thread:$0]  (!%p724_p9), %s162_s25, 32, %s165_s22, %s153_s28  }
  0x2f   : > { %173 = sbr.rel (%p739_p6) target bundleno = 124 (0x7c), region = 28  ;;  %s175_s21 = sand.u32 (!%p739_p6), 1, %s631_s10  }
  0x30   : > { %s465_s4 = smul.u32 (!%p739_p6), 6, %s175_s21  ;;  %s176_s5 = scalar_lea.sflag (!%p739_p6), [#allocation3], %s175_s21 }
  0x32   : > { %s179_s6 = scalar_lea.vmem (!%p739_p6), [#allocation2], %s465_s4 }
  0x34   : > { %618 = dma.done.wait (%p708_p7), %s176_s5, 96  }
  0x35   : > { %620 = vsyncadd (%p708_p7), %s176_s5, 4294967200  ;;  %s452_s7 = sshll.u32 %s175_s21, 1  ;;  %s185_s8 = scalar_lea.sflag [#allocation5], %s175_s21 }
  0x36   : > { %s188_s9 = scalar_lea.vmem [#allocation4], %s452_s7 }
  0x37   : > { %622 = dma.done.wait (%p708_p7), %s185_s8, 32  }
  0x38   : > { %624 = vsyncadd (%p708_p7), %s185_s8, 4294967264  ;;  %p214_p9 = scmp.lt.s32.totalorder %s639_s12, 1  ;;  %v653_v0 = vmov 0.0   ;;  %v225_v1 = vld [vmem:[%s179_s6] sm:$0x3]  ;;  %vm258_vm1 = vcmask 1041408  }
  0x39   : > { %v455_v2 = vld [vmem:[%s179_s6 + $0x2] sm:$0x3]  ;;  %v456_v3 = vld [vmem:[%s179_s6 + $0x4] sm:$0x3]  ;;  %v230_v4 = vld [vmem:[%s188_s9] sm:$0x3] }
  0x3a   : > { %s817_s12 = smov (!%p214_p9, %s639_s12), 1  ;;  %v231_v5 = vmax.f32 %v455_v2, %v456_v3  ;;  %vm254_vm0 = vcmp.eq.s32.totalorder %v230_v4, 2  ;;  %vm248_vm2 = vcmp.eq.s32.totalorder %v230_v4, 0  ;;  %vm251_vm3 = vcmp.eq.s32.totalorder %v230_v4, 1 }
  0x3b   : > { %s462_s27 = sshll.u32 %s817_s12, 4  ;;  %v459_v7 = vsel %vm254_vm0, 1.0, %v653_v0  ;;  %v457_v28 = vsel %vm248_vm2, 1.0, %v653_v0  ;;  %v458_v29 = vsel %vm251_vm3, 1.0, %v653_v0  ;;  %vm324_vm4 = vcmask 1040384  }
  0x3c   : > { %s769_s18 = scalar_lea.vmem %s805_s2, %s462_s27  ;;  %v232_v6 = vmax.f32 %v225_v1, %v231_v5  ;;  %v317_v8 = vsel %vm258_vm1, %v459_v7, 0.0  ;;  %v303_v30 = vsel %vm258_vm1, %v457_v28, 0.0  ;;  %v310_v31 = vsel %vm258_vm1, %v458_v29, 0.0 }
  0x3d   : > { %224 = vst [vmem:[%s769_s18 + $0x8] sm:$0x1] %v653_v0  ;;  %v318_v12 = vrot.slane %v317_v8, 4  ;;  %v304_v32 = vrot.slane %v303_v30, 4  ;;  %v311_v33 = vrot.slane %v310_v31, 4  ;;  %vm327_vm5 = vcmask 1042432  }
  0x3e   : > { %v233_v9 = vsub.f32 %v225_v1, %v232_v6  ;;  %v236_v10 = vsub.f32 %v455_v2, %v232_v6  ;;  %v239_v11 = vsub.f32 %v456_v3, %v232_v6  ;;  %vm329_vm6 = vcmask 1043456  }
  0x3f   : > { %v319_v16 = vadd.f32 %v318_v12, %v317_v8  ;;  %v305_v38 = vadd.f32 %v304_v32, %v303_v30  ;;  %v312_v39 = vadd.f32 %v311_v33, %v310_v31  ;;  %vm331_vm7 = vcmask 1044480  }
  0x40   : > { %v234_v13 = vmul.f32 1.442695, %v233_v9  ;;  %v237_v14 = vmul.f32 1.442695, %v236_v10  ;;  %v240_v15 = vmul.f32 1.442695, %v239_v11 }
  0x41   : > { %v320_v17 = vrot.slane %v319_v16, 2  ;;  %v306_v57 = vrot.slane %v305_v38, 2  ;;  %v313_v58 = vrot.slane %v312_v39, 2  ;;  %vm333_vm8 = vcmask 1045504  }
  0x42   : > { %529 = vpow2.f32 %v234_v13  ;;  %vm335_vm9 = vcmask 1046528  }
  0x43   : > { %531 = vpow2.f32 %v237_v14  ;;  %v321_v18 = vadd.f32 %v320_v17, %v319_v16  ;;  %v314_v8 = vadd.f32 %v313_v58, %v312_v39 }
  0x44   : > { %533 = vpow2.f32 %v240_v15  ;;  %v338_v20 = vld [vmem:[%s769_s18 + $0x8] sm:$0x1] }
  0x45   : > { %v322_v19 = vrot.slane %v321_v18, 1 }
  0x47   : > { %v323_v21 = vadd.f32 %v322_v19, %v321_v18 }
  0x49   : > { %v340_v22 = vadd.f32 %v338_v20, %v323_v21  ;;  %v315_v20 = vrot.slane %v314_v8, 1 }
  0x4b   : > { %342 = vst [vmem:[%s769_s18 + $0x8] sm:$0x1] %v340_v22  ;;  %v316_v30 = vadd.f32 %v315_v20, %v314_v8 }
  0x4f   : > { %v530_v23 = vpop.eup %529 }
  0x50   : > { %v532_v24 = vpop.eup %531 }
  0x51   : > { %v534_v25 = vpop.eup %533  ;;  %v242_v26 = vadd.f32 %v532_v24, %v530_v23 }
  0x53   : > { %v243_v27 = vadd.f32 %v534_v25, %v242_v26 }
  0x55   : > { %535 = vrcp.f32 %v243_v27 }
  0x62   : > { %v536_v34 = vpop.eup %535 }
  0x63   : > { %v245_v35 = vmul.f32 %v536_v34, %v530_v23  ;;  %v246_v36 = vmul.f32 %v536_v34, %v532_v24  ;;  %v247_v37 = vmul.f32 %v536_v34, %v534_v25 }
  0x65   : > { %v257_v40 = vmul.f32 %v457_v28, %v245_v35  ;;  %v266_v41 = vmul.f32 %v458_v29, %v246_v36  ;;  %v274_v42 = vmul.f32 %v459_v7, %v247_v37  ;;  %v282_v43 = vsel %vm258_vm1, %v245_v35, 0.0 }
  0x66   : > { %v283_v44 = vrot.slane %v282_v43, 4  ;;  %v289_v45 = vsel %vm258_vm1, %v246_v36, 0.0  ;;  %v296_v46 = vsel %vm258_vm1, %v247_v37, 0.0  ;;  %v307_v7 = vadd.f32 %v306_v57, %v305_v38 }
  0x67   : > { %v259_v47 = vsel %vm258_vm1, %v257_v40, 0.0  ;;  %v267_v48 = vsel %vm258_vm1, %v266_v41, 0.0  ;;  %v275_v49 = vsel %vm258_vm1, %v274_v42, 0.0  ;;  %v290_v50 = vrot.slane %v289_v45, 4 }
  0x68   : > { %v260_v51 = vrot.slane %v259_v47, 4  ;;  %v268_v52 = vrot.slane %v267_v48, 4  ;;  %v276_v53 = vrot.slane %v275_v49, 4  ;;  %v284_v54 = vadd.f32 %v283_v44, %v282_v43 }
  0x69   : > { %v291_v55 = vadd.f32 %v290_v50, %v289_v45  ;;  %v297_v56 = vrot.slane %v296_v46, 4  ;;  %v308_v19 = vrot.slane %v307_v7, 1 }
  0x6a   : > { %v261_v59 = vadd.f32 %v260_v51, %v259_v47  ;;  %v269_v60 = vadd.f32 %v268_v52, %v267_v48  ;;  %v277_v61 = vadd.f32 %v276_v53, %v275_v49  ;;  %v285_v62 = vrot.slane %v284_v54, 2 }
  0x6b   : > { %v292_v63 = vrot.slane %v291_v55, 2  ;;  %v298_v0 = vadd.f32 %v297_v56, %v296_v46  ;;  %v309_v28 = vadd.f32 %v308_v19, %v307_v7 }
  0x6c   : > { %v262_v1 = vrot.slane %v261_v59, 2  ;;  %v270_v2 = vrot.slane %v269_v60, 2  ;;  %v278_v3 = vrot.slane %v277_v61, 2  ;;  %v286_v4 = vadd.f32 %v285_v62, %v284_v54 }
  0x6d   : > { %v293_v5 = vadd.f32 %v292_v63, %v291_v55  ;;  %v299_v6 = vrot.slane %v298_v0, 2 }
  0x6e   : > { %v263_v9 = vadd.f32 %v262_v1, %v261_v59  ;;  %v271_v10 = vadd.f32 %v270_v2, %v269_v60  ;;  %v279_v11 = vadd.f32 %v278_v3, %v277_v61  ;;  %v287_v12 = vrot.slane %v286_v4, 1 }
  0x6f   : > { %v294_v13 = vrot.slane %v293_v5, 1  ;;  %v300_v14 = vadd.f32 %v299_v6, %v298_v0 }
  0x70   : > { %v264_v15 = vrot.slane %v263_v9, 1  ;;  %v272_v16 = vrot.slane %v271_v10, 1  ;;  %v280_v17 = vrot.slane %v279_v11, 1  ;;  %v288_v24 = vadd.f32 %v287_v12, %v286_v4 }
  0x71   : > { %v301_v18 = vrot.slane %v300_v14, 1  ;;  %v295_v25 = vadd.f32 %v294_v13, %v293_v5 }
  0x72   : > { %v265_v21 = vadd.f32 %v264_v15, %v263_v9  ;;  %v273_v22 = vadd.f32 %v272_v16, %v271_v10  ;;  %v281_v23 = vadd.f32 %v280_v17, %v279_v11 }
  0x73   : > { %v302_v26 = vadd.f32 %v301_v18, %v300_v14 }
  0x74   : > { %v325_v27 = vsel %vm324_vm4, %v265_v21, %v273_v22 }
  0x75   : > { %v326_v29 = vsel %vm258_vm1, %v325_v27, %v281_v23 }
  0x76   : > { %v328_v31 = vsel %vm327_vm5, %v326_v29, %v288_v24 }
  0x77   : > { %v330_v32 = vsel %vm329_vm6, %v328_v31, %v295_v25 }
  0x78   : > { %v332_v33 = vsel %vm331_vm7, %v330_v32, %v302_v26 }
  0x79   : > { %v334_v34 = vsel %vm333_vm8, %v332_v33, %v309_v28 }
  0x7a   : > { %v336_v35 = vsel %vm335_vm9, %v334_v34, %v316_v30 }
  0x7b   : > { %341 = vst [vmem:[%s769_s18] sm:$0xff] %v336_v35 }
  0x7c PF: > { %s18_s14 = sadd.s32 1, %s647_s14   ;;  %s809_s9 = smov %s631_s10 }
  0x7d   : > { %p15_p7 = scmp.ge.s32.totalorder %s18_s14, 4   ;;  %s810_s10 = smov %s635_s11 }
  0x7e   : > { %s811_s11 = smov %s714_s20  ;;  %s812_s12 = smov %s643_s13 }
  0x7f   : > { %s813_s13 = smov %s815_s16  ;;  %17 = sbr.rel (!%p15_p7) target bundleno = 6 (0x6), region = 87 }
  0x84   :  { %364 = vsyncpa [#allocation3], 1 }
  0x85   :  { %366 = vsyncpa [#allocation3 + $0x1], 1 }
  0x86   :  { %367 = vsyncpa [#allocation5], 1 }
  0x87   :  { %369 = vsyncpa [#allocation5 + $0x1], 1 }

</bundles_post_ra>
